<compile_context>
chip_gen: v7x
topology: tpu7x:2x2x1
jax: 0.10.0
libtpu: 0.0.40
codegen_flags: <defaults>
</compile_context>

<pallas_src>
import functools

import jax
import jax.numpy as jnp
from jax.experimental import pallas as pl
from jax.experimental.pallas import tpu as pltpu


# ---------------------------------------------------------------------------
# Tiling / VMEM helpers
# ---------------------------------------------------------------------------
def _vmem_plan():
    """Generation-aware (tile budget, scoped vmem limit) in bytes."""
    try:
        cap = int(pltpu.get_tpu_info().vmem_capacity_bytes)
    except Exception:                      # pragma: no cover - conservative fallback
        cap = 64 * 1024 * 1024             # v7x-safe default
    budget = (cap * 3) // 8                # 24 MiB on v7x (64 MiB), 48 MiB on v5e/v6e
    limit = (cap * 3) // 4                 # 48 MiB on v7x,          96 MiB on v5e/v6e
    return budget, limit


def _sublane_rows(itemsize):
    """Sublane packing granularity: 8 for f32, 16 for bf16, 32 for 8-bit dtypes."""
    return max(8, 32 // int(itemsize))


def _choose_tile_rows(n_rows, d, itemsize, sublane, vmem_budget_bytes,
                      target_step_bytes=8 * 1024 * 1024):
    """Rows per grid step.

    Grow until each step moves >= target_step_bytes of input (3 streams), stay
    inside the VMEM budget (3 inputs x 2 pipeline buffers), never exceed the
    (sublane-rounded) batch, and keep sublane alignment.
    """
    bytes_per_row = 3 * d * itemsize                    # three input streams
    fit = vmem_budget_bytes // (2 * bytes_per_row)      # 2 pipeline buffers each
    want = -(-target_step_bytes // bytes_per_row)       # ceil-div
    n_ceil = -(-n_rows // sublane) * sublane
    tn = min(max(want, sublane), n_ceil)
    tn = min(tn, max(fit, sublane))
    tn = max(sublane, (tn // sublane) * sublane)
    return tn


# ---------------------------------------------------------------------------
# Kernels (per-row losses; reductions finished in the wrapper)
# ---------------------------------------------------------------------------
def _soft_margin_rows_kernel(a_ref, p_ref, n_ref, o_ref):
    """Per-row SoftMarginLoss term: log(1 + exp(-(||a-n||_1 - ||a-p||_1)))."""
    a = a_ref[...]
    p = p_ref[...]
    n = n_ref[...]
    # abs-diffs in the input dtype (native bf16 VPU on v6e/v7x); f32 accumulation.
    ap = jnp.sum(jnp.abs(a - p), axis=-1, keepdims=True, dtype=jnp.float32)
    an = jnp.sum(jnp.abs(a - n), axis=-1, keepdims=True, dtype=jnp.float32)
    x = an - ap                                           # target y = +1
    # Numerically stable log(1 + exp(-x)) = max(-x, 0) + log1p(exp(-|x|))
    o_ref[...] = jnp.maximum(-x, 0.0) + jnp.log1p(jnp.exp(-jnp.abs(x)))


def _triplet_margin_rows_kernel(a_ref, p_ref, n_ref, o_ref, *, margin, eps):
    """Per-row TripletMarginLoss(margin, p=1): max(d_ap - d_an + margin, 0)."""
    a = a_ref[...]
    p = p_ref[...]
    n = n_ref[...]
    # eps as a weakly-typed Python float keeps the input dtype (matches torch
    # pairwise_distance which adds eps before the abs for p=1).
    d_ap = jnp.sum(jnp.abs(a - p + eps), axis=-1, keepdims=True, dtype=jnp.float32)
    d_an = jnp.sum(jnp.abs(a - n + eps), axis=-1, keepdims=True, dtype=jnp.float32)
    o_ref[...] = jnp.maximum(d_ap - d_an + margin, 0.0)


# ---------------------------------------------------------------------------
# Wrapper
# ---------------------------------------------------------------------------
class TripletLossPallas:
    """Pallas TPU implementation of the PyTorch TripletLoss module."""

    # Matches nn.TripletMarginLoss(margin=0.15, p=1, reduce=False) in the spec:
    # the PyTorch module ignores the constructor's `margin` value for the loss.
    _LOSS_MARGIN = 0.15
    _EPS = 1e-6                                   # torch pairwise_distance eps

    def __init__(self, margin=None):
        self.margin = margin

    def __call__(self, anchor, pos, neg, tile_rows=None):
        assert anchor.ndim == 2 and anchor.shape == pos.shape == neg.shape
        N, D = anchor.shape
        itemsize = int(jnp.dtype(anchor.dtype).itemsize)
        sublane = _sublane_rows(itemsize)
        budget, vmem_limit = _vmem_plan()

        if tile_rows is None:
            tn = _choose_tile_rows(N, D, itemsize, sublane, budget)
        else:
            tn = max(sublane, (int(tile_rows) // sublane) * sublane)

        num_tiles = pl.cdiv(N, tn)
        n_out = num_tiles * tn                # padded output rows (cheap alloc, no copy)

        in_spec = pl.BlockSpec((tn, D), lambda i: (i, 0))
        out_spec = pl.BlockSpec((tn, 1), lambda i: (i, 0))

        is_soft = self.margin is None
        if is_soft:
            kernel = _soft_margin_rows_kernel
        else:
            kernel = functools.partial(
                _triplet_margin_rows_kernel, margin=self._LOSS_MARGIN, eps=self._EPS)

        cost = pl.CostEstimate(
            flops=8 * N * D,
            transcendentals=(2 * N if is_soft else 0),
            bytes_accessed=3 * N * D * itemsize + n_out * 4)

        per_row = pl.pallas_call(
            kernel,
            out_shape=jax.ShapeDtypeStruct((n_out, 1), jnp.float32),
            grid=(num_tiles,),
            in_specs=[in_spec, in_spec, in_spec],
            out_specs=out_spec,
            compiler_params=pltpu.CompilerParams(
                dimension_semantics=("parallel",),   # independent tiles; v7x uses 2 TCs
                vmem_limit_bytes=vmem_limit),
            cost_estimate=cost,
        )(anchor, pos, neg)

        # Slice off edge-tile rows (undefined values from OOB reads) BEFORE any
        # reduction, so garbage can never contaminate the mean.
        per_row = per_row[:N, 0]
        if is_soft:
            return jnp.mean(per_row)          # scalar (SoftMarginLoss mean reduction)
        return per_row                        # (N,)  (reduce=False in torch)


# ---------------------------------------------------------------------------
# Pure-JAX references (for self-check)
# ---------------------------------------------------------------------------
def _ref_soft_margin(a, p, n):
    a, p, n = (t.astype(jnp.float32) for t in (a, p, n))
    ap = jnp.sum(jnp.abs(a - p), axis=-1)
    an = jnp.sum(jnp.abs(a - n), axis=-1)
    x = an - ap
    return jnp.mean(jnp.maximum(-x, 0.0) + jnp.log1p(jnp.exp(-jnp.abs(x))))


def _ref_margin(a, p, n):
    eps, margin = 1e-6, 0.15
    a, p, n = (t.astype(jnp.float32) for t in (a, p, n))
    d_ap = jnp.sum(jnp.abs(a - p + eps), axis=-1)
    d_an = jnp.sum(jnp.abs(a - n + eps), axis=-1)
    return jnp.maximum(d_ap - d_an + margin, 0.0)


# ---------------------------------------------------------------------------
if __name__ == "__main__":
    # --- small, single-tile case --------------------------------------------
    k1, k2, k3 = jax.random.split(jax.random.PRNGKey(0), 3)
    N, D = 8, 128
    anchor = jax.random.normal(k1, (N, D), dtype=jnp.float32)
    pos = jax.random.normal(k2, (N, D), dtype=jnp.float32)
    neg = jax.random.normal(k3, (N, D), dtype=jnp.float32)

    soft_loss = TripletLossPallas(margin=None)(anchor, pos, neg)
    jax.block_until_ready(soft_loss)
    ref_soft = _ref_soft_margin(anchor, pos, neg)
    assert jnp.allclose(soft_loss, ref_soft, atol=1e-5, rtol=1e-5), (soft_loss, ref_soft)

    margin_loss = TripletLossPallas(margin=0.15)(anchor, pos, neg)
    jax.block_until_ready(margin_loss)
    ref_m = _ref_margin(anchor, pos, neg)
    assert margin_loss.shape == (N,)
    assert jnp.allclose(margin_loss, ref_m, atol=1e-5, rtol=1e-5), (margin_loss, ref_m)

    # --- ragged batch, default (single big tile) path ------------------------
    k4, k5, k6 = jax.random.split(jax.random.PRNGKey(1), 3)
    N2, D2 = 21, 256                      # not a multiple of the sublane tile
    a2 = jax.random.normal(k4, (N2, D2), dtype=jnp.float32)
    p2 = jax.random.normal(k5, (N2, D2), dtype=jnp.float32)
    n2 = jax.random.normal(k6, (N2, D2), dtype=jnp.float32)

    soft_def = TripletLossPallas(margin=None)(a2, p2, n2)
    jax.block_until_ready(soft_def)
    assert jnp.allclose(soft_def, _ref_soft_margin(a2, p2, n2), atol=1e-5, rtol=1e-5)

    m_def = TripletLossPallas(margin=0.3)(a2, p2, n2)           # 0.15 used (as torch)
    jax.block_until_ready(m_def)
    assert m_def.shape == (N2,)
    assert jnp.allclose(m_def, _ref_margin(a2, p2, n2), atol=1e-5, rtol=1e-5)

    # --- forced multi-tile case (exercises pipelined grid + edge block) ------
    soft2 = TripletLossPallas(margin=None)(a2, p2, n2, tile_rows=8)   # 3 grid steps
    jax.block_until_ready(soft2)
    assert jnp.allclose(soft2, _ref_soft_margin(a2, p2, n2), atol=1e-5, rtol=1e-5)

    m2 = TripletLossPallas(margin=0.3)(a2, p2, n2, tile_rows=8)
    jax.block_until_ready(m2)
    assert m2.shape == (N2,)
    assert jnp.allclose(m2, _ref_margin(a2, p2, n2), atol=1e-5, rtol=1e-5)

    print("KERNEL_OK")
</pallas_src>

<mosaic_0001>
module attributes {stable_mosaic.version = 11 : i64} {
  func.func @_soft_margin_rows_kernel(%arg0: i32, %arg1: memref<8x128xf32, #tpu.memory_space<vmem>>, %arg2: memref<8x128xf32, #tpu.memory_space<vmem>>, %arg3: memref<8x128xf32, #tpu.memory_space<vmem>>, %arg4: memref<8x1xf32, #tpu.memory_space<vmem>>) attributes {dimension_semantics = [#tpu.dimension_semantics<parallel>], iteration_bounds = array<i64: 1>, scalar_prefetch = 0 : i64, scratch_operands = 0 : i64, tpu.core_type = #tpu.core_type<tc>, window_params = [{transform_indices = @transform_0, window_bounds = array<i64: 8, 128>}, {transform_indices = @transform_1, window_bounds = array<i64: 8, 128>}, {transform_indices = @transform_2, window_bounds = array<i64: 8, 128>}, {transform_indices = @transform_3, window_bounds = array<i64: 8, 1>}]} {
    %c0 = arith.constant 0 : index
    %c0_0 = arith.constant 0 : index
    %0 = vector.load %arg1[%c0, %c0_0] : memref<8x128xf32, #tpu.memory_space<vmem>>, vector<8x128xf32>
    %c0_1 = arith.constant 0 : index
    %c0_2 = arith.constant 0 : index
    %1 = vector.load %arg2[%c0_1, %c0_2] : memref<8x128xf32, #tpu.memory_space<vmem>>, vector<8x128xf32>
    %c0_3 = arith.constant 0 : index
    %c0_4 = arith.constant 0 : index
    %2 = vector.load %arg3[%c0_3, %c0_4] : memref<8x128xf32, #tpu.memory_space<vmem>>, vector<8x128xf32>
    %3 = arith.subf %0, %1 : vector<8x128xf32>
    %4 = math.absf %3 : vector<8x128xf32>
    %cst = arith.constant dense<0.000000e+00> : vector<8xf32>
    %5 = vector.multi_reduction <add>, %4, %cst [1] : vector<8x128xf32> to vector<8xf32>
    %6 = vector.shape_cast %5 : vector<8xf32> to vector<8x1xf32>
    %7 = arith.subf %0, %2 : vector<8x128xf32>
    %8 = math.absf %7 : vector<8x128xf32>
    %cst_5 = arith.constant dense<0.000000e+00> : vector<8xf32>
    %9 = vector.multi_reduction <add>, %8, %cst_5 [1] : vector<8x128xf32> to vector<8xf32>
    %10 = vector.shape_cast %9 : vector<8xf32> to vector<8x1xf32>
    %11 = arith.subf %10, %6 : vector<8x1xf32>
    %cst_6 = arith.constant 0.000000e+00 : f32
    %12 = vector.broadcast %cst_6 : f32 to vector<8x1xf32>
    %13 = arith.subf %12, %11 : vector<8x1xf32>
    %cst_7 = arith.constant 0.000000e+00 : f32
    %14 = vector.broadcast %cst_7 : f32 to vector<8x1xf32>
    %15 = arith.maximumf %13, %14 : vector<8x1xf32>
    %16 = math.absf %11 : vector<8x1xf32>
    %cst_8 = arith.constant 0.000000e+00 : f32
    %17 = vector.broadcast %cst_8 : f32 to vector<8x1xf32>
    %18 = arith.subf %17, %16 : vector<8x1xf32>
    %19 = math.exp %18 : vector<8x1xf32>
    %20 = math.log1p %19 : vector<8x1xf32>
    %21 = arith.addf %15, %20 : vector<8x1xf32>
    %c0_9 = arith.constant 0 : index
    %c0_10 = arith.constant 0 : index
    %22 = vector.load %arg4[%c0_9, %c0_10] : memref<8x1xf32, #tpu.memory_space<vmem>>, vector<8x1xf32>
    tpu.vector_store %arg4[%c0_9, %c0_10], %21 {strides = array<i32>} : memref<8x1xf32, #tpu.memory_space<vmem>>, vector<8x1xf32>,
    return
  }
  func.func @transform_0(%arg0: i32) -> (i32, i32) {
    %c0_i32 = arith.constant 0 : i32
    %c0_i32_0 = arith.constant 0 : i32
    return %arg0, %c0_i32 : i32, i32
  }
  func.func @transform_1(%arg0: i32) -> (i32, i32) {
    %c0_i32 = arith.constant 0 : i32
    %c0_i32_0 = arith.constant 0 : i32
    return %arg0, %c0_i32 : i32, i32
  }
  func.func @transform_2(%arg0: i32) -> (i32, i32) {
    %c0_i32 = arith.constant 0 : i32
    %c0_i32_0 = arith.constant 0 : i32
    return %arg0, %c0_i32 : i32, i32
  }
  func.func @transform_3(%arg0: i32) -> (i32, i32) {
    %c0_i32 = arith.constant 0 : i32
    %c0_i32_0 = arith.constant 0 : i32
    return %arg0, %c0_i32 : i32, i32
  }
}

</mosaic_0001>

<bundles_post_ra>
// kernel: tpu_custom_call.1
= control target key start
LH: loop header
LB: loop body
LE: loop exit
PB: predicated region body
PF: predicated region fallthrough
CT: control target
= control target key end

     0   :  { %8 = vsyncpa [#allocation3], 0  ;;  %s224_s0 = inlined_call_operand.hbm [shape: f32[8,128], index: 0, kind: input, shape index: {}]   ;;  %s225_s1 = inlined_call_operand.hbm [shape: f32[8,128], index: 1, kind: input, shape index: {}]   ;;  %s226_s2 = inlined_call_operand.hbm [shape: f32[8,128], index: 2, kind: input, shape index: {}]   ;;  %s227_s3 = inlined_call_operand.vmem [shape: f32[8,1], index: 3, kind: output, shape index: {}]  }
   0x1   :  { %9 = vsyncpa [#allocation5], 0  ;;  %s162_s12 = smov [#allocation4]   ;;  %s163_s14 = smov [#allocation2]  }
   0x2   :  { %s26_s13 = sshll.u32 %s162_s12, 4  ;;  %s16_s15 = sshll.u32 %s163_s14, 4  ;;  %s27_s13 = int_to_ptr.vmem [resolvable:$true] %s26_s13  ;;  %s17_s15 = int_to_ptr.vmem [resolvable:$true] %s16_s15 }
   0x3   :  { %s92_s18 = scalar_lea.hbm %s225_s1, 128 }
   0x4   :  { %p93_p0 = scmp.ne.s32.totalorder %s225_s1, %s92_s18  ;;  %p96_p1 = scmp.lt.u32.totalorder %s92_s18, %s225_s1 }
   0x6   :  { %p98_p2 = pnand %p96_p1, %p93_p0 }
   0x8   :  { %101 = shalt.err (!%p98_p2)
}
   0x9   :  { %s102_s23 = scalar_lea.vmem %s27_s13, 128  ;;  %p107_p4 = scmp.lt.s32.totalorder %s27_s13, %s27_s13 }
   0xa   :  { %p103_p3 = scmp.ne.s32.totalorder %s27_s13, %s102_s23  ;;  %p108_p5 = scmp.lt.s32.totalorder %s102_s23, %s102_s23 }
   0xc   :  { %p109_p6 = por %p108_p5, %p107_p4 }
   0xe   :  { %p110_p7 = pnand %p109_p6, %p103_p3 }
  0x10   :  { %113 = shalt.err (!%p110_p7)
}
  0x11   :  { %29 = dma.hbm_to_vmem [thread:$0]  %s225_s1, 128, %s27_s13, [#allocation5]  }
  0x12   :  { %s114_s28 = scalar_lea.hbm %s224_s0, 128 }
  0x13   :  { %p115_p8 = scmp.ne.s32.totalorder %s224_s0, %s114_s28  ;;  %p118_p9 = scmp.lt.u32.totalorder %s114_s28, %s224_s0 }
  0x15   :  { %p120_p10 = pnand %p118_p9, %p115_p8 }
  0x17   :  { %123 = shalt.err (!%p120_p10)
}
  0x18   :  { %s124_s6 = scalar_lea.vmem %s17_s15, 128  ;;  %p129_p12 = scmp.lt.s32.totalorder %s17_s15, %s17_s15 }
  0x19   :  { %p125_p11 = scmp.ne.s32.totalorder %s17_s15, %s124_s6  ;;  %p130_p13 = scmp.lt.s32.totalorder %s124_s6, %s124_s6 }
  0x1b   :  { %p131_p0 = por %p130_p13, %p129_p12 }
  0x1d   :  { %p132_p1 = pnand %p131_p0, %p125_p11 }
  0x1f   :  { %135 = shalt.err (!%p132_p1)
}
  0x20   :  { %19 = dma.hbm_to_vmem [thread:$0]  %s224_s0, 128, %s17_s15, [#allocation3]  }
  0x21   :  { %s164_s8 = smov [#allocation6]   ;;  %s136_s12 = scalar_lea.hbm %s226_s2, 128 }
  0x22   :  { %s36_s9 = sshll.u32 %s164_s8, 4  ;;  %p137_p2 = scmp.ne.s32.totalorder %s226_s2, %s136_s12  ;;  %s37_s9 = int_to_ptr.vmem [resolvable:$true] %s36_s9 }
  0x23   :  { %p140_p3 = scmp.lt.u32.totalorder %s136_s12, %s226_s2 }
  0x25   :  { %p142_p4 = pnand %p140_p3, %p137_p2 }
  0x27   :  { %145 = shalt.err (!%p142_p4)
}
  0x28   :  { %s146_s18 = scalar_lea.vmem %s37_s9, 128  ;;  %p151_p6 = scmp.lt.s32.totalorder %s37_s9, %s37_s9 }
  0x29   :  { %p147_p5 = scmp.ne.s32.totalorder %s37_s9, %s146_s18  ;;  %p152_p7 = scmp.lt.s32.totalorder %s146_s18, %s146_s18 }
  0x2b   :  { %p153_p8 = por %p152_p7, %p151_p6 }
  0x2d   :  { %p154_p9 = pnand %p153_p8, %p147_p5 }
  0x2f   :  { %157 = shalt.err (!%p154_p9)
}
  0x30   :  { %39 = dma.hbm_to_vmem [thread:$0]  %s226_s2, 128, %s37_s9, [#allocation5]  }
  0x31   :  { %158 = dma.done.wait [#allocation3], 128  }
  0x32   :  { %159 = vsyncadd [#allocation3], 4294967168 }
  0x33   :  { %160 = dma.done.wait [#allocation5], 256  }
  0x34   :  { %161 = vsyncadd [#allocation5], 4294967040  ;;  %v49_v0 = vld [vmem:[#allocation2] sm:$0xff]  ;;  %v50_v1 = vld [vmem:[#allocation4] sm:$0xff]  ;;  %vm77_vm1 = vcmask 7168  }
  0x35   :  { %v51_v2 = vld [vmem:[#allocation6] sm:$0xff]  ;;  %v52_v3 = vsub.f32 %v49_v0, %v50_v1 }
  0x36   :  { %v56_v4 = vsub.f32 %v49_v0, %v51_v2 }
  0x37   :  { %v53_v5 = vand.u32 2147483647, %v52_v3 }
  0x38   :  { %v57_v6 = vand.u32 2147483647, %v56_v4 }
  0x39   :  { %54 = vadd.xlane.f32.xlu0 %v53_v5 }
  0x3d   :  { %58 = vadd.xlane.f32.xlu0 %v57_v6 }
  0xc6   :  { %v55_v7 = vpop.xlane.xlu0 %54 }
  0xca   :  { %v59_v8 = vpop.xlane.xlu0 %58 }
  0xcb   :  { %v60_v9 = vsub.f32 %v59_v8, %v55_v7 }
  0xcd   :  { %v63_v10 = vand.u32 2147483647, %v60_v9  ;;  %v61_v17 = vsub.f32 0.0, %v60_v9 }
  0xcf   :  { %v64_v11 = vsub.f32 0.0, %v63_v10  ;;  %v62_v22 = vmax.f32 %v61_v17, 0.0 }
  0xd1   :  { %v65_v12 = vmul.f32 1.442695, %v64_v11 }
  0xd3   :  { %88 = vpow2.f32 %v65_v12 }
  0xdd   :  { %v89_v13 = vpop.eup %88 }
  0xde   :  { %v67_v14 = vadd.f32 1.0, %v89_v13  ;;  %v70_v15 = vmul.f32 -0.5, %v89_v13  ;;  %v73_v18 = vand.u32 2147483647, %v89_v13 }
  0xe0   :  { %90 = vlog2.f32 %v67_v14  ;;  %v71_v16 = vadd.f32 1.0, %v70_v15  ;;  %vm74_vm0 = vcmp.lt.f32.partialorder %v73_v18, 0.0004427343 }
  0xe2   :  { %v72_v21 = vmul.f32 %v89_v13, %v71_v16 }
  0xea   :  { %v91_v19 = vpop.eup %90 }
  0xeb   :  { %v69_v20 = vmul.f32 0.6931472, %v91_v19 }
  0xed   :  { %v75_v23 = vsel %vm74_vm0, %v72_v21, %v69_v20 }
  0xee   :  { %v76_v24 = vadd.f32 %v75_v23, %v62_v22 }
  0xf0   :  { %78 = vst.msk [vmem:[%s227_s3] sm:$0xff] %vm77_vm1, %v76_v24 }
  0xf1   :  { %83 = vsyncpa [#allocation3], 1 }
  0xf2   :  { %84 = vsyncpa [#allocation5], 1 }

</bundles_post_ra>
